<compile_context>
chip_gen: v7x
topology: tpu7x:2x2x1
jax: 0.10.0
libtpu: 0.0.40
codegen_flags: <defaults>
</compile_context>

<pallas_src>
import functools

import jax
import jax.numpy as jnp
from jax.experimental import pallas as pl
from jax.experimental.pallas import tpu as pltpu


def _round_up(a, b):
    return (a + b - 1) // b * b


def _pick_tile(hw, k, cc, cout, tm_target, budget_bytes=20 * 2 ** 20):
    """Largest tile (multiple of 128, <= padded HW, <= target) whose
    double-buffered kernel-A footprint fits the VMEM budget."""
    tm = min(_round_up(max(tm_target, 128), 128), _round_up(hw, 128))

    def footprint(t):
        return (2 * k * t * 2          # bf16 patch block, double buffered
                + 2 * cout * t * 2     # bf16 y block, double buffered
                + 2 * cc * k * 2       # bf16 weights (conservatively 2x)
                + 4 * cout * 128 * 4   # f32 stat partials (2 outs x 2 bufs)
                + 2 * cc * 4)          # bias

    while tm > 128 and footprint(tm) > budget_bytes:
        tm -= 128
    return tm, footprint(tm)


# ---------------------------------------------------------------------------
# Kernel A: conv (bf16 MXU matmul, transposed layout) + bias, maxpool reused
# from the same bf16 tap slabs, channel-sliced bf16 store (no concat), masked
# per-channel sum / ssq accumulation for BatchNorm statistics.
# Grid = (N parallel, P spatial-chunks parallel, T_inner arbitrary).
# ---------------------------------------------------------------------------
def _fuse_kernel(patch_ref, w_ref, b_ref, y_ref, sum_ref, ssq_ref,
                 *, cin, cc, hw, tm, t_inner, need_mask):
    p_chunk = pl.program_id(1)
    t = pl.program_id(2)

    pb = patch_ref[0]                                      # (9*cin, tm) bf16

    # Conv as a lane-dense MXU matmul: (Cc, K) @ (K, tm), f32 accumulate.
    mm = jnp.dot(w_ref[...], pb, preferred_element_type=jnp.float32)
    conv = mm + b_ref[...]

    # MaxPool 2x2 stride 2: taps (1,1),(1,2),(2,1),(2,2) == patch slabs 4,5,7,8.
    pool16 = jnp.maximum(
        jnp.maximum(pb[4 * cin:5 * cin], pb[5 * cin:6 * cin]),
        jnp.maximum(pb[7 * cin:8 * cin], pb[8 * cin:9 * cin]))
    pool = pool16.astype(jnp.float32)

    # Channel "concat" = two disjoint sublane-slice stores (no relayout).
    y_ref[0, :cc, :] = conv.astype(jnp.bfloat16)
    y_ref[0, cc:, :] = pool16

    @pl.when(t == 0)
    def _():
        sum_ref[...] = jnp.zeros_like(sum_ref)
        ssq_ref[...] = jnp.zeros_like(ssq_ref)

    # Conv stats use the pre-bias matmul output (shift-invariant variance);
    # bias is re-added to the mean in the glue.  Zero out spatial padding.
    if need_mask:
        pos = (p_chunk * t_inner + t) * tm + jax.lax.broadcasted_iota(
            jnp.int32, (1, tm), 1)
        mask = pos < hw
        cm = jnp.where(mask, mm, 0.0)
        pm = jnp.where(mask, pool, 0.0)
    else:
        cm, pm = mm, pool

    def fold(v):       # tm lanes -> 128-lane partials via static slices + VPU adds
        acc = v[:, 0:128]
        for i in range(1, tm // 128):
            acc = acc + v[:, i * 128:(i + 1) * 128]
        return acc

    sum_ref[0, 0, :cc, :] += fold(cm)
    sum_ref[0, 0, cc:, :] += fold(pm)
    ssq_ref[0, 0, :cc, :] += fold(cm * cm)
    ssq_ref[0, 0, cc:, :] += fold(pm * pm)


# ---------------------------------------------------------------------------
# Kernel B: BatchNorm folded to one f32 FMA (scale/shift precomputed) + ReLU,
# reading the bf16 intermediate, lane-dense blocks, (N, Cout, spatial) layout.
# ---------------------------------------------------------------------------
def _bn_relu_kernel(y_ref, scale_ref, shift_ref, o_ref):
    y = y_ref[...].astype(jnp.float32)
    o_ref[...] = jnp.maximum(y * scale_ref[...] + shift_ref[...], 0.0)


def downsampler_block(x, w, b, gamma, beta, eps=1e-3, tm_target=1024):
    """x: (N, Cin, H, W) f32 NCHW; returns (N, Cout, H//2, W//2) f32 NCHW."""
    N, Cin, H, W = x.shape
    assert H % 2 == 0 and W % 2 == 0
    Cc = w.shape[0]              # noutput - ninput
    Cout = Cc + Cin              # noutput
    Ho, Wo = H // 2, W // 2
    HW = Ho * Wo
    M = N * HW
    K = 9 * Cin

    tm, fp_a = _pick_tile(HW, K, Cc, Cout, tm_target)
    Sp = _round_up(HW, tm)
    T = Sp // tm
    if T >= 2:                   # give v7x's 2nd TensorCore spatial work too
        P = 2
        Sp = _round_up(HW, 2 * tm)
        T = Sp // tm
    else:
        P = 1
    T_inner = T // P
    need_mask = (Sp != HW)

    # ---- glue: 9 conv taps (im2col), bf16 at the source, lane-dense layout ----
    # TODO(synk): replace with in-kernel tap construction from a padded input
    # row stripe (manual DMA + lane shifts) to drop this ~4.5x-input HBM stream.
    xb = x.astype(jnp.bfloat16)
    xp = jnp.pad(xb, ((0, 0), (0, 0), (1, 1), (1, 1)))
    taps = [xp[:, :, kh:kh + 2 * Ho:2, kw:kw + 2 * Wo:2]
            for kh in range(3) for kw in range(3)]          # 9 x (N,Cin,Ho,Wo)
    patches = jnp.concatenate(taps, axis=1).reshape(N, K, HW)
    if need_mask:
        patches = jnp.pad(patches, ((0, 0), (0, 0), (0, Sp - HW)))

    # weight (Cc,Cin,3,3) -> (Cc, 9*Cin), row index (kh*3+kw)*Cin + c
    w_mat = w.transpose(0, 2, 3, 1).reshape(Cc, K).astype(jnp.bfloat16)
    b_col = b.reshape(Cc, 1).astype(jnp.float32)

    kern_a = functools.partial(_fuse_kernel, cin=Cin, cc=Cc, hw=HW, tm=tm,
                               t_inner=T_inner, need_mask=need_mask)
    vmem_limit = int(min(48 * 2 ** 20, max(24 * 2 ** 20, 2 * fp_a)))

    y, s1, s2 = pl.pallas_call(
        kern_a,
        out_shape=(jax.ShapeDtypeStruct((N, Cout, Sp), jnp.bfloat16),
                   jax.ShapeDtypeStruct((N, P, Cout, 128), jnp.float32),
                   jax.ShapeDtypeStruct((N, P, Cout, 128), jnp.float32)),
        grid_spec=pltpu.PrefetchScalarGridSpec(
            num_scalar_prefetch=0,
            grid=(N, P, T_inner),
            in_specs=[
                pl.BlockSpec((1, K, tm),
                             lambda n, p, t: (n, 0, p * T_inner + t)),
                pl.BlockSpec((Cc, K), lambda n, p, t: (0, 0)),
                pl.BlockSpec((Cc, 1), lambda n, p, t: (0, 0)),
            ],
            out_specs=[
                pl.BlockSpec((1, Cout, tm),
                             lambda n, p, t: (n, 0, p * T_inner + t)),
                pl.BlockSpec((1, 1, Cout, 128), lambda n, p, t: (n, p, 0, 0)),
                pl.BlockSpec((1, 1, Cout, 128), lambda n, p, t: (n, p, 0, 0)),
            ],
        ),
        compiler_params=pltpu.CompilerParams(
            dimension_semantics=("parallel", "parallel", "arbitrary"),
            vmem_limit_bytes=vmem_limit),
    )(patches, w_mat, b_col)

    # ---- glue: finalize BN stats (biased var) and fold into scale/shift ----
    s1t = s1.sum(axis=(0, 1, 3))                  # (Cout,) — conv rows pre-bias
    s2t = s2.sum(axis=(0, 1, 3))
    m0 = s1t / M
    var = jnp.maximum(s2t / M - m0 * m0, 0.0)     # shift-invariant for conv rows
    mean = m0.at[:Cc].add(b)                      # re-add conv bias to the mean
    scale = gamma * jax.lax.rsqrt(var + eps)
    shift = beta - mean * scale

    out = pl.pallas_call(
        _bn_relu_kernel,
        out_shape=jax.ShapeDtypeStruct((N, Cout, Sp), jnp.float32),
        grid_spec=pltpu.PrefetchScalarGridSpec(
            num_scalar_prefetch=0,
            grid=(N, T),
            in_specs=[
                pl.BlockSpec((1, Cout, tm), lambda n, t: (n, 0, t)),
                pl.BlockSpec((1, Cout, 1), lambda n, t: (0, 0, 0)),
                pl.BlockSpec((1, Cout, 1), lambda n, t: (0, 0, 0)),
            ],
            out_specs=pl.BlockSpec((1, Cout, tm), lambda n, t: (n, 0, t)),
        ),
        compiler_params=pltpu.CompilerParams(
            dimension_semantics=("parallel", "parallel"),
            vmem_limit_bytes=vmem_limit),
    )(y, scale.reshape(1, Cout, 1).astype(jnp.float32),
      shift.reshape(1, Cout, 1).astype(jnp.float32))

    if need_mask:                     # drop spatial padding (skip copy if none)
        out = out[:, :, :HW]
    return out.reshape(N, Cout, Ho, Wo)


# ---------------------------------------------------------------------------
# Pure-JAX reference (independent code path) for a correctness check.
# ---------------------------------------------------------------------------
def reference_forward(x, w, b, gamma, beta, eps=1e-3):
    conv = jax.lax.conv_general_dilated(
        x, w, window_strides=(2, 2), padding=((1, 1), (1, 1)),
        dimension_numbers=('NCHW', 'OIHW', 'NCHW')) + b[None, :, None, None]
    N, C, H, W = x.shape
    pool = x.reshape(N, C, H // 2, 2, W // 2, 2).max(axis=(3, 5))
    y = jnp.concatenate([conv, pool], axis=1)
    mean = y.mean(axis=(0, 2, 3), keepdims=True)
    var = ((y - mean) ** 2).mean(axis=(0, 2, 3), keepdims=True)
    yn = (y - mean) * jax.lax.rsqrt(var + eps) \
        * gamma[None, :, None, None] + beta[None, :, None, None]
    return jnp.maximum(yn, 0.0)


if __name__ == "__main__":
    # DownsamplerBlock(ninput=4, noutput=8) on a (2, 4, 16, 16) input.
    N, Cin, H, W = 2, 4, 16, 16
    noutput = 8
    Cc = noutput - Cin

    key = jax.random.PRNGKey(0)
    kx, kw, kb, kg, kbe = jax.random.split(key, 5)
    x = jax.random.normal(kx, (N, Cin, H, W), jnp.float32)
    w = 0.1 * jax.random.normal(kw, (Cc, Cin, 3, 3), jnp.float32)
    b = 0.1 * jax.random.normal(kb, (Cc,), jnp.float32)
    gamma = 1.0 + 0.1 * jax.random.normal(kg, (noutput,), jnp.float32)
    beta = 0.1 * jax.random.normal(kbe, (noutput,), jnp.float32)

    out = jax.jit(downsampler_block)(x, w, b, gamma, beta)
    out = jax.block_until_ready(out)

    ref = reference_forward(x, w, b, gamma, beta)
    assert out.shape == (N, noutput, H // 2, W // 2)
    err = float(jnp.max(jnp.abs(out - ref)))
    # bf16 conv/pool inputs and the bf16 y intermediate bound post-BN accuracy
    # at a few e-2; BN statistics and the final FMA stay in f32.
    assert err < 5e-2, f"mismatch vs reference: {err}"
    print("KERNEL_OK")
</pallas_src>

<mosaic_0001>
module attributes {stable_mosaic.version = 11 : i64} {
  func.func @_fuse_kernel(%arg0: i32, %arg1: i32, %arg2: i32, %arg3: memref<1x36x128xbf16, #tpu.memory_space<vmem>>, %arg4: memref<4x36xbf16, #tpu.memory_space<vmem>>, %arg5: memref<4x1xf32, #tpu.memory_space<vmem>>, %arg6: memref<1x8x128xbf16, #tpu.memory_space<vmem>>, %arg7: memref<1x1x8x128xf32, #tpu.memory_space<vmem>>, %arg8: memref<1x1x8x128xf32, #tpu.memory_space<vmem>>) attributes {dimension_semantics = [#tpu.dimension_semantics<parallel>, #tpu.dimension_semantics<parallel>, #tpu.dimension_semantics<arbitrary>], iteration_bounds = array<i64: 2, 1, 1>, scalar_prefetch = 0 : i64, scratch_operands = 0 : i64, tpu.core_type = #tpu.core_type<tc>, window_params = [{transform_indices = @transform_0, window_bounds = array<i64: 1, 36, 128>}, {pipeline_mode = #tpu.pipeline_mode<synchronous>, transform_indices = @transform_1, window_bounds = array<i64: 4, 36>}, {pipeline_mode = #tpu.pipeline_mode<synchronous>, transform_indices = @transform_2, window_bounds = array<i64: 4, 1>}, {transform_indices = @transform_3, window_bounds = array<i64: 1, 8, 128>}, {transform_indices = @transform_4, window_bounds = array<i64: 1, 1, 8, 128>}, {transform_indices = @transform_5, window_bounds = array<i64: 1, 1, 8, 128>}]} {
    %c0 = arith.constant 0 : index
    %c0_0 = arith.constant 0 : index
    %c0_1 = arith.constant 0 : index
    %0 = vector.load %arg3[%c0, %c0_0, %c0_1] : memref<1x36x128xbf16, #tpu.memory_space<vmem>>, vector<1x36x128xbf16>
    %1 = vector.shape_cast %0 : vector<1x36x128xbf16> to vector<36x128xbf16>
    %c0_2 = arith.constant 0 : index
    %c0_3 = arith.constant 0 : index
    %2 = vector.load %arg4[%c0_2, %c0_3] : memref<4x36xbf16, #tpu.memory_space<vmem>>, vector<4x36xbf16>
    %cst = arith.constant dense<0.000000e+00> : vector<4x128xf32>
    %3 = tpu.matmul %2, %1, %cst {dimension_numbers = #tpu.dot_dimension_numbers<[1], [0], [0], [1], [0, 0, 1, 1], [], []>} : vector<4x36xbf16>, vector<36x128xbf16>, vector<4x128xf32> -> vector<4x128xf32>
    %c0_4 = arith.constant 0 : index
    %c0_5 = arith.constant 0 : index
    %4 = vector.load %arg5[%c0_4, %c0_5] : memref<4x1xf32, #tpu.memory_space<vmem>>, vector<4x1xf32>
    %5 = vector.broadcast %4 : vector<4x1xf32> to vector<4x128xf32>
    %6 = arith.addf %3, %5 : vector<4x128xf32>
    %7 = vector.extract_strided_slice %1 {offsets = [16, 0], sizes = [4, 128], strides = [1, 1]} : vector<36x128xbf16> to vector<4x128xbf16>
    %8 = vector.extract_strided_slice %1 {offsets = [20, 0], sizes = [4, 128], strides = [1, 1]} : vector<36x128xbf16> to vector<4x128xbf16>
    %9 = arith.maximumf %7, %8 : vector<4x128xbf16>
    %10 = vector.extract_strided_slice %1 {offsets = [28, 0], sizes = [4, 128], strides = [1, 1]} : vector<36x128xbf16> to vector<4x128xbf16>
    %11 = vector.extract_strided_slice %1 {offsets = [32, 0], sizes = [4, 128], strides = [1, 1]} : vector<36x128xbf16> to vector<4x128xbf16>
    %12 = arith.maximumf %10, %11 : vector<4x128xbf16>
    %13 = arith.maximumf %9, %12 : vector<4x128xbf16>
    %14 = arith.extf %13 : vector<4x128xbf16> to vector<4x128xf32>
    %15 = arith.truncf %6 : vector<4x128xf32> to vector<4x128xbf16>
    %c0_6 = arith.constant 0 : index
    %c0_7 = arith.constant 0 : index
    %c0_8 = arith.constant 0 : index
    %16 = vector.load %arg6[%c0_6, %c0_7, %c0_8] : memref<1x8x128xbf16, #tpu.memory_space<vmem>>, vector<1x4x128xbf16>
    %17 = vector.shape_cast %16 : vector<1x4x128xbf16> to vector<4x128xbf16>
    %18 = vector.shape_cast %15 : vector<4x128xbf16> to vector<1x4x128xbf16>
    tpu.vector_store %arg6[%c0_6, %c0_7, %c0_8], %18 {strides = array<i32>} : memref<1x8x128xbf16, #tpu.memory_space<vmem>>, vector<1x4x128xbf16>,
    %c0_9 = arith.constant 0 : index
    %c4 = arith.constant 4 : index
    %c0_10 = arith.constant 0 : index
    %19 = vector.load %arg6[%c0_9, %c4, %c0_10] : memref<1x8x128xbf16, #tpu.memory_space<vmem>>, vector<1x4x128xbf16>
    %20 = vector.shape_cast %19 : vector<1x4x128xbf16> to vector<4x128xbf16>
    %21 = vector.shape_cast %13 : vector<4x128xbf16> to vector<1x4x128xbf16>
    tpu.vector_store %arg6[%c0_9, %c4, %c0_10], %21 {strides = array<i32>} : memref<1x8x128xbf16, #tpu.memory_space<vmem>>, vector<1x4x128xbf16>,
    %c0_i32 = arith.constant 0 : i32
    %22 = arith.cmpi eq, %arg2, %c0_i32 : i32
    %23 = arith.extui %22 : i1 to i32
    %c0_i32_11 = arith.constant 0 : i32
    %24 = arith.cmpi ne, %23, %c0_i32_11 : i32
    scf.if %24 {
      %cst_46 = arith.constant 0.000000e+00 : f32
      %67 = vector.broadcast %cst_46 : f32 to vector<1x1x8x128xf32>
      %c0_47 = arith.constant 0 : index
      %c0_48 = arith.constant 0 : index
      %c0_49 = arith.constant 0 : index
      %c0_50 = arith.constant 0 : index
      %68 = vector.load %arg7[%c0_47, %c0_48, %c0_49, %c0_50] : memref<1x1x8x128xf32, #tpu.memory_space<vmem>>, vector<1x1x8x128xf32>
      tpu.vector_store %arg7[%c0_47, %c0_48, %c0_49, %c0_50], %67 {strides = array<i32>} : memref<1x1x8x128xf32, #tpu.memory_space<vmem>>, vector<1x1x8x128xf32>,
      %cst_51 = arith.constant 0.000000e+00 : f32
      %69 = vector.broadcast %cst_51 : f32 to vector<1x1x8x128xf32>
      %c0_52 = arith.constant 0 : index
      %c0_53 = arith.constant 0 : index
      %c0_54 = arith.constant 0 : index
      %c0_55 = arith.constant 0 : index
      %70 = vector.load %arg8[%c0_52, %c0_53, %c0_54, %c0_55] : memref<1x1x8x128xf32, #tpu.memory_space<vmem>>, vector<1x1x8x128xf32>
      tpu.vector_store %arg8[%c0_52, %c0_53, %c0_54, %c0_55], %69 {strides = array<i32>} : memref<1x1x8x128xf32, #tpu.memory_space<vmem>>, vector<1x1x8x128xf32>,
    } else {
    }
    %c1_i32 = arith.constant 1 : i32
    %25 = arith.muli %arg1, %c1_i32 : i32
    %26 = arith.addi %25, %arg2 : i32
    %c128_i32 = arith.constant 128 : i32
    %27 = arith.muli %26, %c128_i32 : i32
    %28 = tpu.iota {dimensions = array<i32: 1>} : vector<1x128xi32>
    %29 = vector.broadcast %27 : i32 to vector<1x128xi32>
    %30 = arith.addi %29, %28 : vector<1x128xi32>
    %c64_i32 = arith.constant 64 : i32
    %31 = vector.broadcast %c64_i32 : i32 to vector<1x128xi32>
    %32 = arith.cmpi slt, %30, %31 : vector<1x128xi32>
    %cst_12 = arith.constant 0.000000e+00 : f32
    %33 = vector.shape_cast %32 : vector<1x128xi1> to vector<1x128xi1>
    %34 = vector.broadcast %33 : vector<1x128xi1> to vector<4x128xi1>
    %35 = vector.broadcast %cst_12 : f32 to vector<4x128xf32>
    %36 = arith.select %34, %3, %35 : vector<4x128xi1>, vector<4x128xf32>
    %cst_13 = arith.constant 0.000000e+00 : f32
    %37 = vector.shape_cast %32 : vector<1x128xi1> to vector<1x128xi1>
    %38 = vector.broadcast %37 : vector<1x128xi1> to vector<4x128xi1>
    %39 = vector.broadcast %cst_13 : f32 to vector<4x128xf32>
    %40 = arith.select %38, %14, %39 : vector<4x128xi1>, vector<4x128xf32>
    %c0_14 = arith.constant 0 : index
    %c0_15 = arith.constant 0 : index
    %c0_16 = arith.constant 0 : index
    %c0_17 = arith.constant 0 : index
    %41 = vector.load %arg7[%c0_14, %c0_15, %c0_16, %c0_17] : memref<1x1x8x128xf32, #tpu.memory_space<vmem>>, vector<1x1x4x128xf32>
    %42 = vector.shape_cast %41 : vector<1x1x4x128xf32> to vector<4x128xf32>
    %43 = arith.addf %42, %36 : vector<4x128xf32>
    %c0_18 = arith.constant 0 : index
    %c0_19 = arith.constant 0 : index
    %c0_20 = arith.constant 0 : index
    %c0_21 = arith.constant 0 : index
    %44 = vector.load %arg7[%c0_18, %c0_19, %c0_20, %c0_21] : memref<1x1x8x128xf32, #tpu.memory_space<vmem>>, vector<1x1x4x128xf32>
    %45 = vector.shape_cast %44 : vector<1x1x4x128xf32> to vector<4x128xf32>
    %46 = vector.shape_cast %43 : vector<4x128xf32> to vector<1x1x4x128xf32>
    tpu.vector_store %arg7[%c0_18, %c0_19, %c0_20, %c0_21], %46 {strides = array<i32>} : memref<1x1x8x128xf32, #tpu.memory_space<vmem>>, vector<1x1x4x128xf32>,
    %c0_22 = arith.constant 0 : index
    %c0_23 = arith.constant 0 : index
    %c4_24 = arith.constant 4 : index
    %c0_25 = arith.constant 0 : index
    %47 = vector.load %arg7[%c0_22, %c0_23, %c4_24, %c0_25] : memref<1x1x8x128xf32, #tpu.memory_space<vmem>>, vector<1x1x4x128xf32>
    %48 = vector.shape_cast %47 : vector<1x1x4x128xf32> to vector<4x128xf32>
    %49 = arith.addf %48, %40 : vector<4x128xf32>
    %c0_26 = arith.constant 0 : index
    %c0_27 = arith.constant 0 : index
    %c4_28 = arith.constant 4 : index
    %c0_29 = arith.constant 0 : index
    %50 = vector.load %arg7[%c0_26, %c0_27, %c4_28, %c0_29] : memref<1x1x8x128xf32, #tpu.memory_space<vmem>>, vector<1x1x4x128xf32>
    %51 = vector.shape_cast %50 : vector<1x1x4x128xf32> to vector<4x128xf32>
    %52 = vector.shape_cast %49 : vector<4x128xf32> to vector<1x1x4x128xf32>
    tpu.vector_store %arg7[%c0_26, %c0_27, %c4_28, %c0_29], %52 {strides = array<i32>} : memref<1x1x8x128xf32, #tpu.memory_space<vmem>>, vector<1x1x4x128xf32>,
    %c0_30 = arith.constant 0 : index
    %c0_31 = arith.constant 0 : index
    %c0_32 = arith.constant 0 : index
    %c0_33 = arith.constant 0 : index
    %53 = vector.load %arg8[%c0_30, %c0_31, %c0_32, %c0_33] : memref<1x1x8x128xf32, #tpu.memory_space<vmem>>, vector<1x1x4x128xf32>
    %54 = vector.shape_cast %53 : vector<1x1x4x128xf32> to vector<4x128xf32>
    %55 = arith.mulf %36, %36 : vector<4x128xf32>
    %56 = arith.addf %54, %55 : vector<4x128xf32>
    %c0_34 = arith.constant 0 : index
    %c0_35 = arith.constant 0 : index
    %c0_36 = arith.constant 0 : index
    %c0_37 = arith.constant 0 : index
    %57 = vector.load %arg8[%c0_34, %c0_35, %c0_36, %c0_37] : memref<1x1x8x128xf32, #tpu.memory_space<vmem>>, vector<1x1x4x128xf32>
    %58 = vector.shape_cast %57 : vector<1x1x4x128xf32> to vector<4x128xf32>
    %59 = vector.shape_cast %56 : vector<4x128xf32> to vector<1x1x4x128xf32>
    tpu.vector_store %arg8[%c0_34, %c0_35, %c0_36, %c0_37], %59 {strides = array<i32>} : memref<1x1x8x128xf32, #tpu.memory_space<vmem>>, vector<1x1x4x128xf32>,
    %c0_38 = arith.constant 0 : index
    %c0_39 = arith.constant 0 : index
    %c4_40 = arith.constant 4 : index
    %c0_41 = arith.constant 0 : index
    %60 = vector.load %arg8[%c0_38, %c0_39, %c4_40, %c0_41] : memref<1x1x8x128xf32, #tpu.memory_space<vmem>>, vector<1x1x4x128xf32>
    %61 = vector.shape_cast %60 : vector<1x1x4x128xf32> to vector<4x128xf32>
    %62 = arith.mulf %40, %40 : vector<4x128xf32>
    %63 = arith.addf %61, %62 : vector<4x128xf32>
    %c0_42 = arith.constant 0 : index
    %c0_43 = arith.constant 0 : index
    %c4_44 = arith.constant 4 : index
    %c0_45 = arith.constant 0 : index
    %64 = vector.load %arg8[%c0_42, %c0_43, %c4_44, %c0_45] : memref<1x1x8x128xf32, #tpu.memory_space<vmem>>, vector<1x1x4x128xf32>
    %65 = vector.shape_cast %64 : vector<1x1x4x128xf32> to vector<4x128xf32>
    %66 = vector.shape_cast %63 : vector<4x128xf32> to vector<1x1x4x128xf32>
    tpu.vector_store %arg8[%c0_42, %c0_43, %c4_44, %c0_45], %66 {strides = array<i32>} : memref<1x1x8x128xf32, #tpu.memory_space<vmem>>, vector<1x1x4x128xf32>,
    return
  }
  func.func @transform_0(%arg0: i32, %arg1: i32, %arg2: i32) -> (i32, i32, i32) {
    %c1_i32 = arith.constant 1 : i32
    %0 = arith.muli %arg1, %c1_i32 : i32
    %1 = arith.addi %0, %arg2 : i32
    %c0_i32 = arith.constant 0 : i32
    %c0_i32_0 = arith.constant 0 : i32
    return %arg0, %c0_i32, %1 : i32, i32, i32
  }
  func.func @transform_1(%arg0: i32, %arg1: i32, %arg2: i32) -> (i32, i32) {
    %c0_i32 = arith.constant 0 : i32
    %c0_i32_0 = arith.constant 0 : i32
    %c0_i32_1 = arith.constant 0 : i32
    return %c0_i32, %c0_i32_0 : i32, i32
  }
  func.func @transform_2(%arg0: i32, %arg1: i32, %arg2: i32) -> (i32, i32) {
    %c0_i32 = arith.constant 0 : i32
    %c0_i32_0 = arith.constant 0 : i32
    %c0_i32_1 = arith.constant 0 : i32
    return %c0_i32, %c0_i32_0 : i32, i32
  }
  func.func @transform_3(%arg0: i32, %arg1: i32, %arg2: i32) -> (i32, i32, i32) {
    %c1_i32 = arith.constant 1 : i32
    %0 = arith.muli %arg1, %c1_i32 : i32
    %1 = arith.addi %0, %arg2 : i32
    %c0_i32 = arith.constant 0 : i32
    %c0_i32_0 = arith.constant 0 : i32
    return %arg0, %c0_i32, %1 : i32, i32, i32
  }
  func.func @transform_4(%arg0: i32, %arg1: i32, %arg2: i32) -> (i32, i32, i32, i32) {
    %c0_i32 = arith.constant 0 : i32
    %c0_i32_0 = arith.constant 0 : i32
    %c0_i32_1 = arith.constant 0 : i32
    return %arg0, %arg1, %c0_i32, %c0_i32_0 : i32, i32, i32, i32
  }
  func.func @transform_5(%arg0: i32, %arg1: i32, %arg2: i32) -> (i32, i32, i32, i32) {
    %c0_i32 = arith.constant 0 : i32
    %c0_i32_0 = arith.constant 0 : i32
    %c0_i32_1 = arith.constant 0 : i32
    return %arg0, %arg1, %c0_i32, %c0_i32_0 : i32, i32, i32, i32
  }
}

module attributes {stable_mosaic.version = 11 : i64} {
  func.func @_bn_relu_kernel(%arg0: i32, %arg1: i32, %arg2: memref<1x8x128xbf16, #tpu.memory_space<vmem>>, %arg3: memref<1x8x1xf32, #tpu.memory_space<vmem>>, %arg4: memref<1x8x1xf32, #tpu.memory_space<vmem>>, %arg5: memref<1x8x128xf32, #tpu.memory_space<vmem>>) attributes {dimension_semantics = [#tpu.dimension_semantics<parallel>, #tpu.dimension_semantics<parallel>], iteration_bounds = array<i64: 2, 1>, scalar_prefetch = 0 : i64, scratch_operands = 0 : i64, tpu.core_type = #tpu.core_type<tc>, window_params = [{transform_indices = @transform_0, window_bounds = array<i64: 1, 8, 128>}, {pipeline_mode = #tpu.pipeline_mode<synchronous>, transform_indices = @transform_1, window_bounds = array<i64: 1, 8, 1>}, {pipeline_mode = #tpu.pipeline_mode<synchronous>, transform_indices = @transform_2, window_bounds = array<i64: 1, 8, 1>}, {transform_indices = @transform_3, window_bounds = array<i64: 1, 8, 128>}]} {
    %c0 = arith.constant 0 : index
    %c0_0 = arith.constant 0 : index
    %c0_1 = arith.constant 0 : index
    %0 = vector.load %arg2[%c0, %c0_0, %c0_1] : memref<1x8x128xbf16, #tpu.memory_space<vmem>>, vector<1x8x128xbf16>
    %1 = arith.extf %0 : vector<1x8x128xbf16> to vector<1x8x128xf32>
    %c0_2 = arith.constant 0 : index
    %c0_3 = arith.constant 0 : index
    %c0_4 = arith.constant 0 : index
    %2 = vector.load %arg3[%c0_2, %c0_3, %c0_4] : memref<1x8x1xf32, #tpu.memory_space<vmem>>, vector<1x8x1xf32>
    %3 = vector.broadcast %2 : vector<1x8x1xf32> to vector<1x8x128xf32>
    %4 = arith.mulf %1, %3 : vector<1x8x128xf32>
    %c0_5 = arith.constant 0 : index
    %c0_6 = arith.constant 0 : index
    %c0_7 = arith.constant 0 : index
    %5 = vector.load %arg4[%c0_5, %c0_6, %c0_7] : memref<1x8x1xf32, #tpu.memory_space<vmem>>, vector<1x8x1xf32>
    %6 = vector.broadcast %5 : vector<1x8x1xf32> to vector<1x8x128xf32>
    %7 = arith.addf %4, %6 : vector<1x8x128xf32>
    %cst = arith.constant 0.000000e+00 : f32
    %8 = vector.broadcast %cst : f32 to vector<1x8x128xf32>
    %9 = arith.maximumf %7, %8 : vector<1x8x128xf32>
    %c0_8 = arith.constant 0 : index
    %c0_9 = arith.constant 0 : index
    %c0_10 = arith.constant 0 : index
    %10 = vector.load %arg5[%c0_8, %c0_9, %c0_10] : memref<1x8x128xf32, #tpu.memory_space<vmem>>, vector<1x8x128xf32>
    tpu.vector_store %arg5[%c0_8, %c0_9, %c0_10], %9 {strides = array<i32>} : memref<1x8x128xf32, #tpu.memory_space<vmem>>, vector<1x8x128xf32>,
    return
  }
  func.func @transform_0(%arg0: i32, %arg1: i32) -> (i32, i32, i32) {
    %c0_i32 = arith.constant 0 : i32
    %c0_i32_0 = arith.constant 0 : i32
    return %arg0, %c0_i32, %arg1 : i32, i32, i32
  }
  func.func @transform_1(%arg0: i32, %arg1: i32) -> (i32, i32, i32) {
    %c0_i32 = arith.constant 0 : i32
    %c0_i32_0 = arith.constant 0 : i32
    %c0_i32_1 = arith.constant 0 : i32
    %c0_i32_2 = arith.constant 0 : i32
    return %c0_i32, %c0_i32_0, %c0_i32_1 : i32, i32, i32
  }
  func.func @transform_2(%arg0: i32, %arg1: i32) -> (i32, i32, i32) {
    %c0_i32 = arith.constant 0 : i32
    %c0_i32_0 = arith.constant 0 : i32
    %c0_i32_1 = arith.constant 0 : i32
    %c0_i32_2 = arith.constant 0 : i32
    return %c0_i32, %c0_i32_0, %c0_i32_1 : i32, i32, i32
  }
  func.func @transform_3(%arg0: i32, %arg1: i32) -> (i32, i32, i32) {
    %c0_i32 = arith.constant 0 : i32
    %c0_i32_0 = arith.constant 0 : i32
    return %arg0, %c0_i32, %arg1 : i32, i32, i32
  }
}

</mosaic_0001>

<bundles_post_ra>
// kernel: downsampler_block.3
= control target key start
LH: loop header
LB: loop body
LE: loop exit
PB: predicated region body
PF: predicated region fallthrough
CT: control target
= control target key end

     0   :  { %s369_s12 = smov 0   ;;  %s371_s13 = smov 0   ;;  %s405_s0 = inlined_call_operand.vmem [shape: bf16[2,8,128], index: 0, kind: input, shape index: {}]   ;;  %s406_s1 = inlined_call_operand.vmem [shape: f32[1,8,1], index: 1, kind: input, shape index: {}]   ;;  %s407_s2 = inlined_call_operand.vmem [shape: f32[1,8,1], index: 2, kind: input, shape index: {}]   ;;  %s408_s3 = inlined_call_operand.vmem [shape: f32[2,8,128], index: 3, kind: output, shape index: {}]  }
   0x1   :  { %s373_s14 = smov 0  }
   0x2 LB: > { %s25_s15 = sadd.s32 1, %s342_s13  ;;  %p293_p0 = scmp.ge.s32.totalorder %s346_s14, 1  ;;  %s346_s14 = sphi %s373_s14, %s13_s14   ;;  %s342_s13 = sphi %s371_s13, %s410_s13   ;;  %s338_s12 = sphi %s369_s12, %s409_s12  }
   0x3   : > { %p27_p1 = scmp.ge.s32.totalorder %s25_s15, 2  ;;  %p155_p2 = scmp.lt.s32.totalorder %s346_s14, 3 }
   0x5   : > { %s412_s15 = smov (%p27_p1, %s25_s15), 0  ;;  %p156_p3 = pnand %p293_p0, %p155_p2 }
   0x6   : > { %v199_v0 = vld [vmem:[%s406_s1] sm:$0xff] (!%p156_p3)  ;;  %v348_v1 = vmov (!%p156_p3), 0   ;;  %p183_p4 = scmp.lt.s32.totalorder (!%p156_p3), %s338_s12, 1 }
   0x7   : > { %159 = sbr.rel (%p156_p3) target bundleno = 145 (0x91), region = 32  ;;  %323 = vset.pattern.permute.xlu0 (!%p156_p3), %v348_v1  ;;  %v206_v2 = vld [vmem:[%s407_s2] sm:$0xff] (!%p156_p3) }
   0x8   : > { %202 = vperm.xlu0 (!%p156_p3), %323, %v199_v0  }
   0xc   : > { %209 = vperm.xlu0 (!%p156_p3), %323, %v206_v2  }
   0xe   : > { %s414_s12 = smov (!%p183_p4, %s338_s12), 1 }
   0xf   : > { %s294_s20 = sshll.u32 %s414_s12, 2  ;;  %s295_s24 = sshll.u32 %s414_s12, 3 }
  0x10   : > { %s189_s23 = scalar_lea.vmem %s405_s0, %s294_s20  ;;  %s196_s27 = scalar_lea.vmem %s408_s3, %s295_s24 }
  0x11   : > { %v197_v3 = vld [vmem:[%s189_s23] sm:$0xf] }
  0x12   : > { %v198_v4 = vunpack.c.l.bf16 %v197_v3 }
  0x87   : > { %v203_v5 = vpop.permute.xlu0 %202 }
  0x88   : > { %v205_v6 = vmul.f32 %v203_v5, %v198_v4 }
  0x8b   : > { %v210_v7 = vpop.permute.xlu0 %209 }
  0x8c   : > { %v212_v8 = vadd.f32 %v210_v7, %v205_v6 }
  0x8e   : > { %v213_v9 = vmax.f32 %v212_v8, 0.0 }
  0x90   : > { %214 = vst [vmem:[%s196_s27] sm:$0xff] %v213_v9 }
  0x91 PF: > { %s13_s14 = sadd.s32 1, %s346_s14   ;;  %s409_s12 = smov %s342_s13 }
  0x92   : > { %p10_p5 = scmp.ge.s32.totalorder %s13_s14, 4   ;;  %s410_s13 = smov %s412_s15 }
  0x94   :  { %12 = sbr.rel (!%p10_p5) target bundleno = 2 (0x2), region = 62 }

// kernel: downsampler_block.2
= control target key start
LH: loop header
LB: loop body
LE: loop exit
PB: predicated region body
PF: predicated region fallthrough
CT: control target
= control target key end

     0   :  { %s723_s18 = smov 0   ;;  %s725_s19 = smov 0   ;;  %s789_s0 = inlined_call_operand.vmem [shape: bf16[2,36,128], index: 0, kind: input, shape index: {}]   ;;  %s790_s1 = inlined_call_operand.vmem [shape: bf16[4,36], index: 1, kind: input, shape index: {}]   ;;  %s791_s2 = inlined_call_operand.vmem [shape: f32[4,1], index: 2, kind: input, shape index: {}]   ;;  %s792_s3 = inlined_call_operand.vmem [shape: bf16[2,8,128], index: 3, kind: output, shape index: {0}]   ;;  %s793_s4 = inlined_call_operand.vmem [shape: f32[2,1,8,128], index: 4, kind: output, shape index: {1}]   ;;  %s794_s5 = inlined_call_operand.vmem [shape: f32[2,1,8,128], index: 5, kind: output, shape index: {2}]  }
   0x1   :  { %s727_s20 = smov 0  }
   0x2 LB: > { %s35_s21 = sadd.s32 1, %s684_s19  ;;  %p607_p0 = scmp.ge.s32.totalorder %s688_s20, 1  ;;  %s688_s20 = sphi %s727_s20, %s16_s20   ;;  %s684_s19 = sphi %s725_s19, %s796_s19   ;;  %s680_s18 = sphi %s723_s18, %s795_s18  }
   0x3   : > { %p37_p1 = scmp.ge.s32.totalorder %s35_s21, 2  ;;  %p228_p2 = scmp.lt.s32.totalorder %s688_s20, 3 }
   0x5   : > { %s798_s21 = smov (%p37_p1, %s35_s21), 0  ;;  %p229_p3 = pnand %p607_p0, %p228_p2 }
   0x6   : > { %p278_p4 = scmp.lt.s32.totalorder (!%p229_p3), %s680_s18, 1  ;;  %v690_v0 = vmov (!%p229_p3), 0.0   ;;  %vm691_vm0 = vmmov (!%p229_p3), 0   ;;  %v380_v1 = vld [vmem:[%s791_s2] sm:$0xf] (!%p229_p3)  ;;  %v692_v2 = vmov (!%p229_p3), 0   ;;  %v414_v16 = vlaneseq (!%p229_p3) }
   0x7   : > { %232 = sbr.rel (%p229_p3) target bundleno = 248 (0xf8), region = 32  ;;  %624 = vmatprep.subr.bf16.mxu0 (!%p229_p3), %v690_v0  ;;  %630 = vmatprep.mubr.msk.bf16.mxu0 (!%p229_p3), %vm691_vm0, %v690_v0  ;;  %vm336_vm1 = vcmask (!%p229_p3), 1041408   ;;  %v316_v12 = vld [vmem:[%s790_s1] sm:$0x3] (!%p229_p3)  ;;  %vm332_vm2 = vcmask (!%p229_p3), 293888  }
   0x8   : > { %662 = vset.pattern.permute.xlu0 (!%p229_p3), %v692_v2  ;;  %v415_v18 = vand.u32 (!%p229_p3), 127, %v414_v16 }
   0x9   : > { %383 = vperm.xlu0 (!%p229_p3), %662, %v380_v1  }
   0xa   : > { %vm418_vm3 = vcmp.lt.s32.totalorder (!%p229_p3), %v415_v18, 64 }
   0xe   : > { %s800_s18 = smov (!%p278_p4, %s680_s18), 1 }
   0xf   : > { %s634_s24 = smul.u32 20, %s800_s18  ;;  %s610_s25 = sshll.u32 %s800_s18, 3 }
  0x10   : > { %s754_s6 = scalar_lea.vmem %s793_s4, %s610_s25  ;;  %s759_s9 = scalar_lea.vmem %s794_s5, %s610_s25 }
  0x11   : > { %s285_s28 = scalar_lea.vmem %s789_s0, %s634_s24  ;;  %410 = vst [vmem:[%s754_s6] sm:$0xff] %v690_v0  ;;  %411 = vst [vmem:[%s759_s9] sm:$0xff] %v690_v0  ;;  %s609_s12 = sshll.u32 %s800_s18, 2 }
  0x12   : > { %v663_v3 = vld [vmem:[%s285_s28] sm:$0xff]   ;;  %v313_v4 = vld [vmem:[%s285_s28 + $0x8] sm:$0xf]  ;;  %v314_v5 = vld [vmem:[%s285_s28 + $0xc] sm:$0xf]  ;;  %s294_s15 = scalar_lea.vmem %s792_s3, %s609_s12 }
  0x13   : > { %v315_v6 = vld [vmem:[%s285_s28 + $0x10] sm:$0x3]  ;;  %625 = vmatpush3.bf16.msra.mxu0 %v663_v3  ;;  %v613_v7 = vcombine.low %v313_v4, %v314_v5  ;;  %v616_v13 = vrot.slane %v313_v4, 10 }
  0x14   : > { %v391_v8 = vrot.slane %v315_v6, 6  ;;  %626 = vmatprep.subr.bf16.mxu0 %v690_v0  ;;  %v614_v9 = vcombine.low %v315_v6, %v315_v6 }
  0x15   : > { %v390_v14 = vmax.bf16 %v616_v13, %v313_v4 }
  0x16   : > { %v393_v10 = vmax.bf16 %v391_v8, %v314_v5  ;;  %v338_v11 = vsel %vm336_vm1, %v614_v9, 0 }
  0x17   : > { %627 = vmatpush3.bf16.msra.mxu0 %v613_v7 }
  0x18   : > { %628 = vmatprep.subr.bf16.mxu0 %v690_v0  ;;  %v617_v15 = vrot.slane %v393_v10, 10  ;;  %v426_v22 = vld [vmem:[%s754_s6 + $0x4] sm:$0xf]  ;;  %v423_v28 = vld [vmem:[%s754_s6] sm:$0xf] }
  0x19   : > { %v433_v23 = vld [vmem:[%s759_s9 + $0x4] sm:$0xf]  ;;  %v429_v32 = vld [vmem:[%s759_s9] sm:$0xf] }
  0x1a   : > { %v398_v17 = vmax.bf16 %v617_v15, %v390_v14 }
  0x1b   : > { %629 = vmatpush3.bf16.msra.mxu0 %v338_v11 }
  0x1c   : > { %v399_v19 = vunpack.c.l.bf16 %v398_v17  ;;  %v403_v24 = vrot.slane %v398_v17, 6 }
  0x1e   : > { %631 = vmatmul.mubr.msk.bf16.vlgmr.msra.gmra.mrb[0].mxu0 %vm332_vm2, %v316_v12  ;;  %v422_v20 = vsel %vm418_vm3, %v399_v19, 0.0  ;;  %405 = vst [vmem:[%s294_s15] sm:$0xc] %v403_v24 }
  0x1f   : > { %v434_v21 = vmul.f32 %v422_v20, %v422_v20  ;;  %v427_v25 = vadd.f32 %v426_v22, %v422_v20 }
  0x21   : > { %v435_v26 = vadd.f32 %v434_v21, %v433_v23  ;;  %428 = vst [vmem:[%s754_s6 + $0x4] sm:$0xf] %v427_v25 }
  0x23   : > { %436 = vst [vmem:[%s759_s9 + $0x4] sm:$0xf] %v435_v26 }
  0x88   : > { %v384_v27 = vpop.permute.xlu0 %383 }
  0xf1   : > { %v374_v29 = vpop.f32.mrb[0].mxu0 }
  0xf2   : > { %v386_v30 = vadd.f32 %v384_v27, %v374_v29  ;;  %v421_v31 = vsel %vm418_vm3, %v374_v29, 0.0  ;;  %v632_v33 = vpop.f32.mrb[1].mxu0 }
  0xf3   : > { %v424_v34 = vadd.f32 %v423_v28, %v421_v31  ;;  %v430_v35 = vmul.f32 %v421_v31, %v421_v31  ;;  %v377_v36 = vpop.f32.mrb[2].mxu0 }
  0xf4   : > { %v400_v37 = vpack.c.bf16 %v386_v30, %v386_v30  ;;  %v633_v38 = vpop.f32.mrb[3].mxu0 }
  0xf5   : > { %425 = vst [vmem:[%s754_s6] sm:$0xf] %v424_v34  ;;  %v431_v39 = vadd.f32 %v430_v35, %v429_v32 }
  0xf6   : > { %401 = vst [vmem:[%s294_s15] sm:$0x3] %v400_v37 }
  0xf7   : > { %432 = vst [vmem:[%s759_s9] sm:$0xf] %v431_v39 }
  0xf8 PF: > { %s16_s20 = sadd.s32 1, %s688_s20   ;;  %s795_s18 = smov %s684_s19 }
  0xf9   : > { %p13_p5 = scmp.ge.s32.totalorder %s16_s20, 4   ;;  %s796_s19 = smov %s798_s21 }
  0xfb   :  { %15 = sbr.rel (!%p13_p5) target bundleno = 2 (0x2), region = 90 }

</bundles_post_ra>
